<compile_context>
chip_gen: v7x
topology: tpu7x:2x2x1
jax: 0.10.0
libtpu: 0.0.40
codegen_flags: <defaults>
</compile_context>

<pallas_src>
import functools

import jax
import jax.numpy as jnp
from jax.experimental import pallas as pl
from jax.experimental.pallas import tpu as pltpu


def _round_up(x, m):
    return (x + m - 1) // m * m


def _link_predictor_kernel(zs_ref, zd_ref, w1a_ref, w1b_ref, b1_ref,
                           w2r_ref, b2_ref, o_ref):
    # lin1 folded over the concat: h = relu(z_src @ W1a + z_dst @ W1b + b1)
    h = jnp.dot(zs_ref[...], w1a_ref[...], preferred_element_type=jnp.float32)
    h = h + jnp.dot(zd_ref[...], w1b_ref[...], preferred_element_type=jnp.float32)
    h = jnp.maximum(h + b1_ref[...], 0.0)

    # TODO(synk): dropout(p=0.2) is identity here (eval/inference mode);
    # training-mode masking would need pltpu.prng_seed/prng_random_bits + seed input.

    # lin2 computed transposed so the result is lane-dense:
    #   logits[0, n] = sum_c w2[0, c] * h[n, c]
    # w2 is replicated to 8 rows in the wrapper so the MXU lhs is sublane-aligned.
    logits = jax.lax.dot_general(
        w2r_ref[...], h,
        dimension_numbers=(((1,), (1,)), ((), ())),
        preferred_element_type=jnp.float32)          # (8, TILE_N)
    logits = logits[0:1, :] + b2_ref[...]            # (1, TILE_N)

    o_ref[0] = jax.nn.sigmoid(logits).astype(o_ref.dtype)


def link_predictor(z_src, z_dst, w1, b1, w2, b2, *, tile_n=None):
    """z_src, z_dst: (N, C).  w1: (C, 2C), b1: (C,), w2: (1, C), b2: (1,).

    Works for f32 inputs; bf16 z/w also fine (matmuls accumulate in f32).
    """
    N, C = z_src.shape
    out_dtype = z_src.dtype

    if tile_n is None:
        # Big tiles amortize per-step overhead; cap padding waste for tiny N.
        tile_n = min(1024, _round_up(max(N, 1), 128))
    g = pl.cdiv(N, tile_n)
    n_pad = g * tile_n

    # --- glue (plain JAX, outside the kernel) ---
    w1a = w1[:, :C].T.astype(z_src.dtype)               # (C, C), acts on z_src
    w1b = w1[:, C:].T.astype(z_src.dtype)                # (C, C), acts on z_dst
    b1r = b1.reshape(1, C).astype(jnp.float32)           # (1, C)
    w2r = jnp.tile(w2.reshape(1, C), (8, 1)).astype(z_src.dtype)   # (8, C)
    b2r = b2.reshape(1, 1).astype(jnp.float32)            # (1, 1)

    if n_pad != N:
        pad = ((0, n_pad - N), (0, 0))
        z_src = jnp.pad(z_src, pad)
        z_dst = jnp.pad(z_dst, pad)

    itemsize = jnp.dtype(z_src.dtype).itemsize
    cost = pl.CostEstimate(
        flops=4 * n_pad * C * C + 4 * n_pad * C,
        transcendentals=n_pad,
        bytes_accessed=itemsize * (2 * n_pad * C + 2 * C * C + 9 * C)
                       + 4 * (C + 1) + jnp.dtype(out_dtype).itemsize * n_pad,
    )

    out3 = pl.pallas_call(
        _link_predictor_kernel,
        out_shape=jax.ShapeDtypeStruct((g, 1, tile_n), out_dtype),
        grid=(g,),
        in_specs=[
            pl.BlockSpec((tile_n, C), lambda i: (i, 0)),   # z_src tile
            pl.BlockSpec((tile_n, C), lambda i: (i, 0)),   # z_dst tile
            pl.BlockSpec((C, C), lambda i: (0, 0)),        # W1a (resident)
            pl.BlockSpec((C, C), lambda i: (0, 0)),        # W1b (resident)
            pl.BlockSpec((1, C), lambda i: (0, 0)),        # b1
            pl.BlockSpec((8, C), lambda i: (0, 0)),        # w2 replicated
            pl.BlockSpec((1, 1), lambda i: (0, 0)),        # b2
        ],
        out_specs=pl.BlockSpec((1, 1, tile_n), lambda i: (i, 0, 0)),
        compiler_params=pltpu.CompilerParams(
            dimension_semantics=("parallel",),
            vmem_limit_bytes=32 * 1024 * 1024,
        ),
        cost_estimate=cost,
    )(z_src, z_dst, w1a, w1b, b1r, w2r, b2r)

    return out3.reshape(n_pad, 1)[:N]


def _reference(z_src, z_dst, w1, b1, w2, b2):
    h = jnp.concatenate([z_src, z_dst], axis=1)
    h = jnp.maximum(h @ w1.T + b1, 0.0)
    return jax.nn.sigmoid(h @ w2.T + b2)


if __name__ == "__main__":
    N, C = 8, 32  # batch of node pairs, in_channels
    key = jax.random.PRNGKey(0)
    k1, k2, k3, k4, k5, k6 = jax.random.split(key, 6)

    z_src = jax.random.normal(k1, (N, C), dtype=jnp.float32)
    z_dst = jax.random.normal(k2, (N, C), dtype=jnp.float32)

    # Deterministic parameter init (uniform, PyTorch-Linear-like bounds).
    bound1 = 1.0 / jnp.sqrt(2.0 * C)
    w1 = jax.random.uniform(k3, (C, 2 * C), jnp.float32, -bound1, bound1)
    b1 = jax.random.uniform(k4, (C,), jnp.float32, -bound1, bound1)
    bound2 = 1.0 / jnp.sqrt(1.0 * C)
    w2 = jax.random.uniform(k5, (1, C), jnp.float32, -bound2, bound2)
    b2 = jax.random.uniform(k6, (1,), jnp.float32, -bound2, bound2)

    out = link_predictor(z_src, z_dst, w1, b1, w2, b2)
    jax.block_until_ready(out)

    ref = _reference(z_src, z_dst, w1, b1, w2, b2)
    assert out.shape == (N, 1)
    assert jnp.allclose(out, ref, atol=1e-5, rtol=1e-5)
    print("KERNEL_OK")
</pallas_src>

<mosaic_0001>
module attributes {stable_mosaic.version = 11 : i64} {
  func.func @_link_predictor_kernel(%arg0: i32, %arg1: memref<128x32xf32, #tpu.memory_space<vmem>>, %arg2: memref<128x32xf32, #tpu.memory_space<vmem>>, %arg3: memref<32x32xf32, #tpu.memory_space<vmem>>, %arg4: memref<32x32xf32, #tpu.memory_space<vmem>>, %arg5: memref<1x32xf32, #tpu.memory_space<vmem>>, %arg6: memref<8x32xf32, #tpu.memory_space<vmem>>, %arg7: memref<1x1xf32, #tpu.memory_space<vmem>>, %arg8: memref<1x1x128xf32, #tpu.memory_space<vmem>>) attributes {dimension_semantics = [#tpu.dimension_semantics<parallel>], iteration_bounds = array<i64: 1>, scalar_prefetch = 0 : i64, scratch_operands = 0 : i64, tpu.core_type = #tpu.core_type<tc>, window_params = [{transform_indices = @transform_0, window_bounds = array<i64: 128, 32>}, {transform_indices = @transform_1, window_bounds = array<i64: 128, 32>}, {pipeline_mode = #tpu.pipeline_mode<synchronous>, transform_indices = @transform_2, window_bounds = array<i64: 32, 32>}, {pipeline_mode = #tpu.pipeline_mode<synchronous>, transform_indices = @transform_3, window_bounds = array<i64: 32, 32>}, {pipeline_mode = #tpu.pipeline_mode<synchronous>, transform_indices = @transform_4, window_bounds = array<i64: 1, 32>}, {pipeline_mode = #tpu.pipeline_mode<synchronous>, transform_indices = @transform_5, window_bounds = array<i64: 8, 32>}, {pipeline_mode = #tpu.pipeline_mode<synchronous>, transform_indices = @transform_6, window_bounds = array<i64: 1, 1>}, {transform_indices = @transform_7, window_bounds = array<i64: 1, 1, 128>}]} {
    %c0 = arith.constant 0 : index
    %c0_0 = arith.constant 0 : index
    %0 = vector.load %arg1[%c0, %c0_0] : memref<128x32xf32, #tpu.memory_space<vmem>>, vector<128x32xf32>
    %c0_1 = arith.constant 0 : index
    %c0_2 = arith.constant 0 : index
    %1 = vector.load %arg3[%c0_1, %c0_2] : memref<32x32xf32, #tpu.memory_space<vmem>>, vector<32x32xf32>
    %cst = arith.constant dense<0.000000e+00> : vector<128x32xf32>
    %2 = tpu.matmul %0, %1, %cst {dimension_numbers = #tpu.dot_dimension_numbers<[1], [0], [0], [1], [0, 0, 1, 1], [], []>} : vector<128x32xf32>, vector<32x32xf32>, vector<128x32xf32> -> vector<128x32xf32>
    %c0_3 = arith.constant 0 : index
    %c0_4 = arith.constant 0 : index
    %3 = vector.load %arg2[%c0_3, %c0_4] : memref<128x32xf32, #tpu.memory_space<vmem>>, vector<128x32xf32>
    %c0_5 = arith.constant 0 : index
    %c0_6 = arith.constant 0 : index
    %4 = vector.load %arg4[%c0_5, %c0_6] : memref<32x32xf32, #tpu.memory_space<vmem>>, vector<32x32xf32>
    %cst_7 = arith.constant dense<0.000000e+00> : vector<128x32xf32>
    %5 = tpu.matmul %3, %4, %cst_7 {dimension_numbers = #tpu.dot_dimension_numbers<[1], [0], [0], [1], [0, 0, 1, 1], [], []>} : vector<128x32xf32>, vector<32x32xf32>, vector<128x32xf32> -> vector<128x32xf32>
    %6 = arith.addf %2, %5 : vector<128x32xf32>
    %c0_8 = arith.constant 0 : index
    %c0_9 = arith.constant 0 : index
    %7 = vector.load %arg5[%c0_8, %c0_9] : memref<1x32xf32, #tpu.memory_space<vmem>>, vector<1x32xf32>
    %8 = vector.broadcast %7 : vector<1x32xf32> to vector<128x32xf32>
    %9 = arith.addf %6, %8 : vector<128x32xf32>
    %cst_10 = arith.constant 0.000000e+00 : f32
    %10 = vector.broadcast %cst_10 : f32 to vector<128x32xf32>
    %11 = arith.maximumf %9, %10 : vector<128x32xf32>
    %c0_11 = arith.constant 0 : index
    %c0_12 = arith.constant 0 : index
    %12 = vector.load %arg6[%c0_11, %c0_12] : memref<8x32xf32, #tpu.memory_space<vmem>>, vector<8x32xf32>
    %cst_13 = arith.constant dense<0.000000e+00> : vector<8x128xf32>
    %13 = tpu.matmul %12, %11, %cst_13 {dimension_numbers = #tpu.dot_dimension_numbers<[1], [1], [0], [0], [0, 0, 1, 0], [], []>} : vector<8x32xf32>, vector<128x32xf32>, vector<8x128xf32> -> vector<8x128xf32>
    %14 = vector.extract_strided_slice %13 {offsets = [0, 0], sizes = [1, 128], strides = [1, 1]} : vector<8x128xf32> to vector<1x128xf32>
    %c0_14 = arith.constant 0 : index
    %c0_15 = arith.constant 0 : index
    %15 = vector.load %arg7[%c0_14, %c0_15] : memref<1x1xf32, #tpu.memory_space<vmem>>, vector<1x1xf32>
    %16 = vector.broadcast %15 : vector<1x1xf32> to vector<1x128xf32>
    %17 = arith.addf %14, %16 : vector<1x128xf32>
    %18 = arith.negf %17 : vector<1x128xf32>
    %19 = math.exp %18 : vector<1x128xf32>
    %cst_16 = arith.constant 1.000000e+00 : f32
    %20 = vector.broadcast %cst_16 : f32 to vector<1x128xf32>
    %21 = arith.addf %20, %19 : vector<1x128xf32>
    %22 = arith.divf %20, %21 : vector<1x128xf32>
    %c0_17 = arith.constant 0 : index
    %c0_18 = arith.constant 0 : index
    %c0_19 = arith.constant 0 : index
    %23 = vector.load %arg8[%c0_17, %c0_18, %c0_19] : memref<1x1x128xf32, #tpu.memory_space<vmem>>, vector<1x1x128xf32>
    %24 = vector.shape_cast %23 : vector<1x1x128xf32> to vector<1x128xf32>
    %25 = vector.shape_cast %22 : vector<1x128xf32> to vector<1x1x128xf32>
    tpu.vector_store %arg8[%c0_17, %c0_18, %c0_19], %25 {strides = array<i32>} : memref<1x1x128xf32, #tpu.memory_space<vmem>>, vector<1x1x128xf32>,
    return
  }
  func.func @transform_0(%arg0: i32) -> (i32, i32) {
    %c0_i32 = arith.constant 0 : i32
    %c0_i32_0 = arith.constant 0 : i32
    return %arg0, %c0_i32 : i32, i32
  }
  func.func @transform_1(%arg0: i32) -> (i32, i32) {
    %c0_i32 = arith.constant 0 : i32
    %c0_i32_0 = arith.constant 0 : i32
    return %arg0, %c0_i32 : i32, i32
  }
  func.func @transform_2(%arg0: i32) -> (i32, i32) {
    %c0_i32 = arith.constant 0 : i32
    %c0_i32_0 = arith.constant 0 : i32
    %c0_i32_1 = arith.constant 0 : i32
    return %c0_i32, %c0_i32_0 : i32, i32
  }
  func.func @transform_3(%arg0: i32) -> (i32, i32) {
    %c0_i32 = arith.constant 0 : i32
    %c0_i32_0 = arith.constant 0 : i32
    %c0_i32_1 = arith.constant 0 : i32
    return %c0_i32, %c0_i32_0 : i32, i32
  }
  func.func @transform_4(%arg0: i32) -> (i32, i32) {
    %c0_i32 = arith.constant 0 : i32
    %c0_i32_0 = arith.constant 0 : i32
    %c0_i32_1 = arith.constant 0 : i32
    return %c0_i32, %c0_i32_0 : i32, i32
  }
  func.func @transform_5(%arg0: i32) -> (i32, i32) {
    %c0_i32 = arith.constant 0 : i32
    %c0_i32_0 = arith.constant 0 : i32
    %c0_i32_1 = arith.constant 0 : i32
    return %c0_i32, %c0_i32_0 : i32, i32
  }
  func.func @transform_6(%arg0: i32) -> (i32, i32) {
    %c0_i32 = arith.constant 0 : i32
    %c0_i32_0 = arith.constant 0 : i32
    %c0_i32_1 = arith.constant 0 : i32
    return %c0_i32, %c0_i32_0 : i32, i32
  }
  func.func @transform_7(%arg0: i32) -> (i32, i32, i32) {
    %c0_i32 = arith.constant 0 : i32
    %c0_i32_0 = arith.constant 0 : i32
    %c0_i32_1 = arith.constant 0 : i32
    return %arg0, %c0_i32, %c0_i32_0 : i32, i32, i32
  }
}

</mosaic_0001>

<bundles_post_ra>
// kernel: tpu_custom_call.1
= control target key start
LH: loop header
LB: loop body
LE: loop exit
PB: predicated region body
PF: predicated region fallthrough
CT: control target
= control target key end

     0   :  { %s1203_s0 = inlined_call_operand.vmem [shape: f32[128,32], index: 0, kind: input, shape index: {}]   ;;  %s1204_s1 = inlined_call_operand.vmem [shape: f32[128,32], index: 1, kind: input, shape index: {}]   ;;  %s1205_s2 = inlined_call_operand.vmem [shape: f32[32,32], index: 2, kind: input, shape index: {}]   ;;  %s1206_s3 = inlined_call_operand.vmem [shape: f32[32,32], index: 3, kind: input, shape index: {}]   ;;  %s1207_s4 = inlined_call_operand.vmem [shape: f32[1,32], index: 4, kind: input, shape index: {}]   ;;  %s1208_s5 = inlined_call_operand.vmem [shape: f32[8,32], index: 5, kind: input, shape index: {}]   ;;  %s1209_s6 = inlined_call_operand.<no memory space> [shape: f32[1,1], index: 6, kind: input, shape index: {}]   ;;  %s1210_s7 = inlined_call_operand.hbm [shape: f32[1,1,128], index: 7, kind: output, shape index: {}]  }
   0x1   :  { %v12_v0 = vstv %s1209_s6 }
   0x2   :  { %13 = vst [vmem:[#allocation2] sm:$0x1] %v12_v0 }
   0x3   :  { %v65_v1 = vld [vmem:[%s1206_s3] sm:$0xff]  ;;  %v66_v2 = vld [vmem:[%s1206_s3 + $0x8] sm:$0xff]  ;;  %v67_v3 = vld [vmem:[%s1206_s3 + $0x10] sm:$0xff]  ;;  %vm69_vm0 = vcmask 261120  }
   0x4   :  { %v856_v4 = vpack.c.bf16 %v66_v2, %v65_v1  ;;  %v68_v5 = vld [vmem:[%s1206_s3 + $0x18] sm:$0xff]  ;;  %v49_v6 = vld [vmem:[%s1204_s1] sm:$0xff]  ;;  %v46_v9 = vld [vmem:[%s1205_s2 + $0x8] sm:$0xff] }
   0x5   :  { %v860_v7 = vpack.c.bf16 %v68_v5, %v67_v3  ;;  %765 = vmatprep.mubr.msk.f32.mxu0 %vm69_vm0, %v49_v6  ;;  %v45_v8 = vld [vmem:[%s1205_s2] sm:$0xff]  ;;  %v47_v11 = vld [vmem:[%s1205_s2 + $0x10] sm:$0xff]  ;;  %v48_v12 = vld [vmem:[%s1205_s2 + $0x18] sm:$0xff] }
   0x6   :  { %857 = vmatprep.subr.bf16.mxu0 %v856_v4  ;;  %v864_v10 = vpack.c.bf16 %v46_v9, %v45_v8  ;;  %v50_v13 = vld [vmem:[%s1204_s1 + $0x8] sm:$0xff]  ;;  %v51_v14 = vld [vmem:[%s1204_s1 + $0x10] sm:$0xff]  ;;  %v868_v15 = vpack.c.bf16 %v48_v12, %v47_v11  ;;  %v52_v16 = vld [vmem:[%s1204_s1 + $0x18] sm:$0xff] }
   0x7   :  { %859 = vmatpush3.bf16.msra.mxu0 %v856_v4  ;;  %v53_v17 = vld [vmem:[%s1204_s1 + $0x20] sm:$0xff] }
   0x8   :  { %861 = vmatprep.subr.bf16.mxu0 %v860_v7 }
   0xb   :  { %863 = vmatpush3.bf16.msra.mxu0 %v860_v7 }
   0xc   :  { %865 = vmatprep.subr.bf16.mxu0 %v864_v10 }
   0xe   :  { %766 = vmatmul.mubr.msk.f32.vlgmr.msra.gmra.mrb[0].mxu0 %vm69_vm0, %v50_v13 }
   0xf   :  { %867 = vmatpush3.bf16.msra.mxu0 %v864_v10  ;;  %768 = vmatprep.mubr.msk.f32.mxu0 %vm69_vm0, %v51_v14 }
  0x10   :  { %869 = vmatprep.subr.bf16.mxu0 %v868_v15 }
  0x11   :  { %14 = vsyncpa [#allocation4], 0  ;;  %v54_v18 = vld [vmem:[%s1204_s1 + $0x28] sm:$0xff]  ;;  %v55_v19 = vld [vmem:[%s1204_s1 + $0x30] sm:$0xff]  ;;  %v954_v45 = vmov 0.0|0.0   ;;  %vm955_vm1 = vmmov 0  }
  0x12   :  { %769 = vmatmul.mubr.msk.f32.gmra.mrb[2].mxu0 %vm69_vm0, %v52_v16  ;;  %v56_v20 = vld [vmem:[%s1204_s1 + $0x38] sm:$0xff]  ;;  %v57_v21 = vld [vmem:[%s1204_s1 + $0x40] sm:$0xff]  ;;  %v58_v22 = vld [vmem:[%s1204_s1 + $0x48] sm:$0xff]  ;;  %872 = vmatprep.subr.bf16.mxu1 %v954_v45  ;;  %v956_v46 = vmov 0.0   ;;  %v957_v48 = vmov 0   ;;  %s958_s28 = smov [#allocation3]  }
  0x13   :  { %771 = vmatprep.mubr.msk.f32.mxu0 %vm69_vm0, %v53_v17  ;;  %871 = vmatpush3.bf16.msra.mxu0 %v868_v15  ;;  %v59_v23 = vld [vmem:[%s1204_s1 + $0x50] sm:$0xff]  ;;  %v60_v24 = vld [vmem:[%s1204_s1 + $0x58] sm:$0xff]  ;;  %v61_v25 = vld [vmem:[%s1204_s1 + $0x60] sm:$0xff]  ;;  %s641_s29 = sshll.u32 %s958_s28, 4  ;;  %s642_s29 = int_to_ptr.vmem [resolvable:$true] %s641_s29 }
  0x14   :  { %v62_v26 = vld [vmem:[%s1204_s1 + $0x68] sm:$0xff]  ;;  %v63_v27 = vld [vmem:[%s1204_s1 + $0x70] sm:$0xff]  ;;  %v64_v28 = vld [vmem:[%s1204_s1 + $0x78] sm:$0xff]  ;;  %853 = vmatprep.mubr.msk.f32.mxu1 %vm955_vm1, %v956_v46  ;;  %925 = vset.pattern.permute.xlu0 %v957_v48  ;;  %s934_s30 = scalar_lea.vmem %s642_s29, 32  ;;  %p935_p1 = scmp.lt.s32.totalorder %s642_s29, %s642_s29 }
  0x15   :  { %v29_v29 = vld [vmem:[%s1203_s0] sm:$0xff]  ;;  %v30_v30 = vld [vmem:[%s1203_s0 + $0x8] sm:$0xff]  ;;  %v31_v31 = vld [vmem:[%s1203_s0 + $0x10] sm:$0xff] }
  0x16   :  { %772 = vmatmul.mubr.msk.f32.gmra.mrb[4].mxu0 %vm69_vm0, %v54_v18  ;;  %v32_v32 = vld [vmem:[%s1203_s0 + $0x18] sm:$0xff]  ;;  %v33_v33 = vld [vmem:[%s1203_s0 + $0x20] sm:$0xff]  ;;  %v34_v34 = vld [vmem:[%s1203_s0 + $0x28] sm:$0xff] }
  0x17   :  { %774 = vmatprep.mubr.msk.f32.mxu0 %vm69_vm0, %v55_v19  ;;  %v35_v35 = vld [vmem:[%s1203_s0 + $0x30] sm:$0xff]  ;;  %v36_v36 = vld [vmem:[%s1203_s0 + $0x38] sm:$0xff]  ;;  %v37_v37 = vld [vmem:[%s1203_s0 + $0x40] sm:$0xff] }
  0x18   :  { %v38_v38 = vld [vmem:[%s1203_s0 + $0x48] sm:$0xff]  ;;  %v39_v39 = vld [vmem:[%s1203_s0 + $0x50] sm:$0xff]  ;;  %v40_v40 = vld [vmem:[%s1203_s0 + $0x58] sm:$0xff] }
  0x19   :  { %v41_v41 = vld [vmem:[%s1203_s0 + $0x60] sm:$0xff]  ;;  %v42_v42 = vld [vmem:[%s1203_s0 + $0x68] sm:$0xff]  ;;  %v43_v43 = vld [vmem:[%s1203_s0 + $0x70] sm:$0xff] }
  0x1a   :  { %775 = vmatmul.mubr.msk.f32.gmra.mrb[6].mxu0 %vm69_vm0, %v56_v20  ;;  %v44_v44 = vld [vmem:[%s1203_s0 + $0x78] sm:$0xff]  ;;  %v617_v47 = vld [vmem:[#allocation2] sm:$0x1]  ;;  %vm1160_vm2 = vmpackc.low %vm69_vm0, %vm69_vm0 }
  0x1b   :  { %777 = vmatprep.mubr.msk.f32.mxu0 %vm69_vm0, %v57_v21  ;;  %620 = vperm.xlu0 %925, %v617_v47   ;;  %v681_v49 = vld [vmem:[%s1207_s4] ss:$0 sm:$0xff] }
  0x1e   :  { %778 = vmatmul.mubr.msk.f32.gmra.mrb[8].mxu0 %vm69_vm0, %v58_v22 }
  0x1f   :  { %780 = vmatprep.mubr.msk.f32.mxu0 %vm69_vm0, %v59_v23 }
  0x22   :  { %781 = vmatmul.mubr.msk.f32.gmra.mrb[10].mxu0 %vm69_vm0, %v60_v24 }
  0x23   :  { %783 = vmatprep.mubr.msk.f32.mxu0 %vm69_vm0, %v61_v25 }
  0x26   :  { %784 = vmatmul.mubr.msk.f32.gmra.mrb[12].mxu0 %vm69_vm0, %v62_v26 }
  0x27   :  { %786 = vmatprep.mubr.msk.f32.mxu0 %vm69_vm0, %v63_v27 }
  0x2a   :  { %787 = vmatmul.mubr.msk.f32.gmra.mrb[14].mxu0 %vm69_vm0, %v64_v28 }
  0x2b   :  { %797 = vmatprep.mubr.msk.f32.mxu0 %vm69_vm0, %v29_v29 }
  0x2e   :  { %798 = vmatmul.mubr.msk.f32.vlgmr.msra.gmra.mrb[0].mxu0 %vm69_vm0, %v30_v30 }
  0x2f   :  { %800 = vmatprep.mubr.msk.f32.mxu0 %vm69_vm0, %v31_v31 }
  0x32   :  { %801 = vmatmul.mubr.msk.f32.gmra.mrb[2].mxu0 %vm69_vm0, %v32_v32 }
  0x33   :  { %803 = vmatprep.mubr.msk.f32.mxu0 %vm69_vm0, %v33_v33 }
  0x36   :  { %804 = vmatmul.mubr.msk.f32.gmra.mrb[4].mxu0 %vm69_vm0, %v34_v34 }
  0x37   :  { %806 = vmatprep.mubr.msk.f32.mxu0 %vm69_vm0, %v35_v35 }
  0x3a   :  { %807 = vmatmul.mubr.msk.f32.gmra.mrb[6].mxu0 %vm69_vm0, %v36_v36 }
  0x3b   :  { %809 = vmatprep.mubr.msk.f32.mxu0 %vm69_vm0, %v37_v37 }
  0x3e   :  { %810 = vmatmul.mubr.msk.f32.gmra.mrb[8].mxu0 %vm69_vm0, %v38_v38 }
  0x3f   :  { %812 = vmatprep.mubr.msk.f32.mxu0 %vm69_vm0, %v39_v39 }
  0x42   :  { %813 = vmatmul.mubr.msk.f32.gmra.mrb[10].mxu0 %vm69_vm0, %v40_v40 }
  0x43   :  { %815 = vmatprep.mubr.msk.f32.mxu0 %vm69_vm0, %v41_v41 }
  0x46   :  { %816 = vmatmul.mubr.msk.f32.gmra.mrb[12].mxu0 %vm69_vm0, %v42_v42 }
  0x47   :  { %818 = vmatprep.mubr.msk.f32.mxu0 %vm69_vm0, %v43_v43  ;;  %v495_v43 = vld [vmem:[%s1208_s5] sm:$0xff]  ;;  %s930_s5 = scalar_lea.vmem %s642_s29, 16 }
  0x48   :  { %p931_p0 = scmp.ne.s32.totalorder %s642_s29, %s930_s5  ;;  %p936_p2 = scmp.lt.s32.totalorder %s934_s30, %s930_s5 }
  0x4a   :  { %819 = vmatmul.mubr.msk.f32.gmra.mrb[14].mxu0 %vm69_vm0, %v44_v44  ;;  %v623_v44 = vlaneseq  ;;  %p937_p3 = por %p936_p2, %p935_p1 }
  0x4c   :  { %v624_v46 = vshrl.u32 %v623_v44, 7  ;;  %p938_p4 = pnand %p937_p3, %p931_p0 }
  0x4e   :  { %v625_v47 = vsub.s32 0, %v624_v46 }
  0x9a   :  { %v621_v48 = vpop.permute.xlu0 %620 }
 0x101   :  { %v799_v50 = vpop.f32.mrb[0].mxu0 }
 0x102   :  { %v464_v51 = vadd.f32 %v799_v50, %v681_v49  ;;  %v377_v52 = vpop.f32.mrb[1].mxu0 }
 0x103   :  { %v463_v53 = vadd.f32 %v681_v49, %v377_v52 }
 0x104   :  { %v480_v54 = vmax.f32 %v464_v51, 0.0 }
 0x105   :  { %v479_v55 = vmax.f32 %v463_v53, 0.0  ;;  %v802_v56 = vpop.f32.mrb[2].mxu0 }
 0x106   :  { %v466_v57 = vadd.f32 %v802_v56, %v681_v49  ;;  %v387_v58 = vpop.f32.mrb[3].mxu0 }
 0x107   :  { %v873_v60 = vpack.c.bf16 %v480_v54, %v479_v55  ;;  %v465_v61 = vadd.f32 %v681_v49, %v387_v58 }
 0x108   :  { %v482_v62 = vmax.f32 %v466_v57, 0.0 }
 0x109   :  { %v481_v63 = vmax.f32 %v465_v61, 0.0  ;;  %v805_v0 = vpop.f32.mrb[4].mxu0  ;;  %875 = vmatpush3.bf16.xpose.msk.msra.mxu1 %vm1160_vm2, %v873_v60 }
 0x10a   :  { %v468_v1 = vadd.f32 %v805_v0, %v681_v49  ;;  %v397_v2 = vpop.f32.mrb[5].mxu0  ;;  %876 = vmatprep.subr.bf16.mxu1 %v954_v45 }
 0x10b   :  { %v877_v3 = vpack.c.bf16 %v482_v62, %v481_v63  ;;  %v467_v4 = vadd.f32 %v681_v49, %v397_v2 }
 0x10c   :  { %v484_v5 = vmax.f32 %v468_v1, 0.0 }
 0x10d   :  { %v483_v6 = vmax.f32 %v467_v4, 0.0  ;;  %v808_v7 = vpop.f32.mrb[6].mxu0 }
 0x10e   :  { %v470_v8 = vadd.f32 %v808_v7, %v681_v49  ;;  %v407_v9 = vpop.f32.mrb[7].mxu0 }
 0x10f   :  { %v881_v10 = vpack.c.bf16 %v484_v5, %v483_v6  ;;  %v469_v11 = vadd.f32 %v681_v49, %v407_v9 }
 0x110   :  { %v486_v12 = vmax.f32 %v470_v8, 0.0 }
 0x111   :  { %v485_v13 = vmax.f32 %v469_v11, 0.0  ;;  %v811_v14 = vpop.f32.mrb[8].mxu0  ;;  %879 = vmatpush3.bf16.xpose.msk.msra.mxu1 %vm1160_vm2, %v877_v3 }
 0x112   :  { %v472_v15 = vadd.f32 %v811_v14, %v681_v49  ;;  %v417_v16 = vpop.f32.mrb[9].mxu0  ;;  %880 = vmatprep.subr.bf16.mxu1 %v954_v45 }
 0x113   :  { %v885_v17 = vpack.c.bf16 %v486_v12, %v485_v13  ;;  %v471_v18 = vadd.f32 %v681_v49, %v417_v16 }
 0x114   :  { %v488_v19 = vmax.f32 %v472_v15, 0.0 }
 0x115   :  { %v487_v20 = vmax.f32 %v471_v18, 0.0  ;;  %v814_v21 = vpop.f32.mrb[10].mxu0 }
 0x116   :  { %v474_v22 = vadd.f32 %v814_v21, %v681_v49  ;;  %v427_v23 = vpop.f32.mrb[11].mxu0 }
 0x117   :  { %v889_v24 = vpack.c.bf16 %v488_v19, %v487_v20  ;;  %v473_v25 = vadd.f32 %v681_v49, %v427_v23 }
 0x118   :  { %v490_v26 = vmax.f32 %v474_v22, 0.0 }
 0x119   :  { %v489_v27 = vmax.f32 %v473_v25, 0.0  ;;  %v817_v28 = vpop.f32.mrb[12].mxu0  ;;  %883 = vmatpush3.bf16.xpose.msk.msra.mxu1 %vm1160_vm2, %v881_v10 }
 0x11a   :  { %v476_v29 = vadd.f32 %v817_v28, %v681_v49  ;;  %v437_v30 = vpop.f32.mrb[13].mxu0  ;;  %884 = vmatprep.subr.bf16.mxu1 %v954_v45 }
 0x11b   :  { %v893_v31 = vpack.c.bf16 %v490_v26, %v489_v27  ;;  %v475_v32 = vadd.f32 %v681_v49, %v437_v30 }
 0x11c   :  { %v492_v33 = vmax.f32 %v476_v29, 0.0 }
 0x11d   :  { %v491_v34 = vmax.f32 %v475_v32, 0.0  ;;  %v820_v35 = vpop.f32.mrb[14].mxu0 }
 0x11e   :  { %v478_v36 = vadd.f32 %v820_v35, %v681_v49  ;;  %v447_v37 = vpop.f32.mrb[15].mxu0 }
 0x11f   :  { %v897_v38 = vpack.c.bf16 %v492_v33, %v491_v34  ;;  %v477_v39 = vadd.f32 %v681_v49, %v447_v37  ;;  %v626_v49 = vrot.slane %v621_v48, %v625_v47 }
 0x120   :  { %v494_v40 = vmax.f32 %v478_v36, 0.0 }
 0x121   :  { %v493_v41 = vmax.f32 %v477_v39, 0.0  ;;  %887 = vmatpush3.bf16.xpose.msk.msra.mxu1 %vm1160_vm2, %v885_v17 }
 0x122   :  { %888 = vmatprep.subr.bf16.mxu1 %v954_v45 }
 0x123   :  { %v901_v42 = vpack.c.bf16 %v494_v40, %v493_v41 }
 0x129   :  { %891 = vmatpush3.bf16.xpose.msk.msra.mxu1 %vm1160_vm2, %v889_v24 }
 0x12a   :  { %892 = vmatprep.subr.bf16.mxu1 %v954_v45 }
 0x131   :  { %895 = vmatpush3.bf16.xpose.msk.msra.mxu1 %vm1160_vm2, %v893_v31 }
 0x132   :  { %896 = vmatprep.subr.bf16.mxu1 %v954_v45 }
 0x139   :  { %899 = vmatpush3.bf16.xpose.msk.msra.mxu1 %vm1160_vm2, %v897_v38 }
 0x13a   :  { %900 = vmatprep.subr.bf16.mxu1 %v954_v45 }
 0x141   :  { %903 = vmatpush3.bf16.xpose.msk.msra.mxu1 %vm1160_vm2, %v901_v42 }
 0x148   :  { %854 = vmatmul.mubr.msk.f32.vlgmr.msra.gmra.mrb[0].mxu1 %vm69_vm0, %v495_v43 }
 0x21b   :  { %v613_v50 = vpop.f32.mrb[0].mxu1 }
 0x21c   :  { %v627_v51 = vadd.f32 %v626_v49, %v613_v50  ;;  %v855_v52 = vpop.f32.mrb[1].mxu1 }
 0x21e   :  { %v699_v53 = vmul.f32 -1.442695, %v627_v51 }
 0x220   :  { %926 = vpow2.f32 %v699_v53 }
 0x22a   :  { %v927_v45 = vpop.eup %926 }
 0x22b   :  { %v631_v54 = vadd.f32 1.0, %v927_v45 }
 0x22d   :  { %928 = vrcp.f32 %v631_v54 }
 0x237   :  { %v929_v55 = vpop.eup %928 }
 0x238   :  { %634 = vst [vmem:[#allocation3] sm:$0x1] %v929_v55 }
 0x239   :  { %941 = shalt.err (!%p938_p4)
}
 0x23a   :  { %s942_s10 = scalar_lea.hbm %s1210_s7, 16 }
 0x23b   :  { %p943_p5 = scmp.ne.s32.totalorder %s1210_s7, %s942_s10  ;;  %p946_p6 = scmp.lt.u32.totalorder %s942_s10, %s1210_s7 }
 0x23d   :  { %p948_p7 = pnand %p946_p6, %p943_p5 }
 0x23f   :  { %951 = shalt.err (!%p948_p7)
}
 0x240   :  { %644 = dma.vmem_to_hbm [thread:$0]  %s642_s29, 16, %s1210_s7, [#allocation4]  }
 0x241   :  { %952 = dma.done.wait [#allocation4], 16  }
 0x242   :  { %953 = vsyncadd [#allocation4], 4294967280 }
 0x243   :  { %648 = vsyncpa [#allocation4], 1 }

</bundles_post_ra>
